<compile_context>
chip_gen: v7x
topology: tpu7x:2x2x1
jax: 0.10.0
libtpu: 0.0.40
codegen_flags: <defaults>
</compile_context>

<pallas_src>
import jax
import jax.numpy as jnp
from jax import lax
from jax.experimental import pallas as pl
from jax.experimental.pallas import tpu as pltpu

_LANES = 128
_SUBLANES = 8
_ROW_ALIGN = 32          # covers sublane packing of f32/bf16/f16/int8/fp8
_MAX_ROW_TILE = 8192     # 8192 x 128 x 4B = 4 MiB f32 tile per grid step
_MiB = 1024 * 1024


def _round_up(x, m):
    return ((x + m - 1) // m) * m


def _make_adv_loss_kernel(*, row_tile, tiles_per_split, n_tiles, n_elems,
                          flat_input, has_extra_tiles):
    block_elems = row_tile * _LANES
    folds = row_tile // _SUBLANES
    partial_last = (n_elems % block_elems) != 0
    # Tiles [0, full_tiles) are entirely in range; tile `full_tiles` (the last
    # real tile) is ragged iff partial_last; any logical tile beyond that is a
    # duplicated trailing tile from the 2-way split and is skipped entirely.
    full_tiles = n_tiles - 1 if partial_last else n_tiles
    needs_gate = partial_last or has_extra_tiles

    def kernel(x_ref, o_ref):
        s = pl.program_id(0)   # parallel split (TensorCore shard on v7x)
        i = pl.program_id(1)   # sequential tile index within the split

        # The output block is resident across the whole i-sweep of a split,
        # so it doubles as the vreg-shaped accumulator (no scratch needed).
        @pl.when(i == 0)
        def _init():
            o_ref[...] = jnp.zeros_like(o_ref)

        logical_tile = s * tiles_per_split + i

        def tile_sq():
            x = x_ref[...]
            if flat_input:
                # (row_tile*128,) and (row_tile, 128) share the same native
                # (8,128)-tiled layout, so this reshape is free.
                x = x.reshape(row_tile, _LANES)
            d = x.astype(jnp.float32) - 1.0
            return d * d            # the /2 is folded into the final divide

        def accumulate(sq):
            # Fold the (row_tile, 128) tile into the vreg-shaped (8, 128)
            # accumulator with pure VPU adds; the cross-lane/sublane reduce
            # to a scalar happens once, in the wrapper.
            acc = sq.reshape(folds, _SUBLANES, _LANES).sum(axis=0)
            o_ref[...] += acc[None]

        if not needs_gate:
            # Every grid point is a full, valid tile: unconditional fast path.
            accumulate(tile_sq())
        else:
            @pl.when(logical_tile < full_tiles)
            def _fast():                       # full tiles: no mask at all
                accumulate(tile_sq())

            if partial_last:
                @pl.when(logical_tile == full_tiles)
                def _ragged():                 # single boundary tile
                    sq = tile_sq()
                    row_ids = lax.broadcasted_iota(
                        jnp.int32, (row_tile, _LANES), 0)
                    col_ids = lax.broadcasted_iota(
                        jnp.int32, (row_tile, _LANES), 1)
                    elem_ids = (logical_tile * block_elems
                                + row_ids * _LANES + col_ids)
                    accumulate(jnp.where(elem_ids < n_elems, sq, 0.0))
            # logical_tile > full_tiles: duplicated trailing tile -> skipped.

    return kernel


def adversarial_loss(fake_outputs: jax.Array) -> jax.Array:
    """Pallas TPU implementation of mean((fake_outputs - 1)^2 / 2)."""
    n_elems = int(fake_outputs.size)
    orig_dtype = fake_outputs.dtype
    itemsize = jnp.dtype(orig_dtype).itemsize

    flat = fake_outputs.reshape(-1)                 # free (contiguous)

    rows_needed = pl.cdiv(n_elems, _LANES)
    row_tile = min(_MAX_ROW_TILE, _round_up(rows_needed, _ROW_ALIGN))
    block_elems = row_tile * _LANES
    n_tiles = pl.cdiv(n_elems, block_elems)

    # 2-way split of the independent tile range: lets both v7x TensorCores
    # stream HBM; on v5e/v6e it is just a sequential outer loop whose one
    # possible duplicated tile is neither re-fetched nor computed.
    num_splits = 2 if n_tiles >= 2 else 1
    tiles_per_split = pl.cdiv(n_tiles, num_splits)
    has_extra_tiles = num_splits * tiles_per_split > n_tiles
    last_tile = n_tiles - 1

    lane_aligned = (n_elems % _LANES) == 0
    if lane_aligned:
        # Free reshape to a lane-dense 2-D slab (no pad, no copy).
        x_in = flat.reshape(n_elems // _LANES, _LANES)
        in_spec = pl.BlockSpec(
            (row_tile, _LANES),
            lambda s, i: (jnp.minimum(s * tiles_per_split + i, last_tile), 0))
    else:
        # Ragged size: stream the 1-D view directly (no jnp.pad copy); the
        # kernel reshapes each block to (row_tile, 128) and masks the tail.
        x_in = flat
        in_spec = pl.BlockSpec(
            (block_elems,),
            lambda s, i: (jnp.minimum(s * tiles_per_split + i, last_tile),))

    kernel = _make_adv_loss_kernel(
        row_tile=row_tile,
        tiles_per_split=tiles_per_split,
        n_tiles=n_tiles,
        n_elems=n_elems,
        flat_input=not lane_aligned,
        has_extra_tiles=has_extra_tiles,
    )

    tile_bytes = block_elems * itemsize
    vmem_limit = int(min(96 * _MiB, max(16 * _MiB, 2 * tile_bytes + 4 * _MiB)))

    partials = pl.pallas_call(
        kernel,
        out_shape=jax.ShapeDtypeStruct(
            (num_splits, _SUBLANES, _LANES), jnp.float32),
        grid_spec=pltpu.PrefetchScalarGridSpec(
            num_scalar_prefetch=0,
            grid=(num_splits, tiles_per_split),
            in_specs=[in_spec],
            out_specs=pl.BlockSpec((1, _SUBLANES, _LANES),
                                   lambda s, i: (s, 0, 0)),
        ),
        compiler_params=pltpu.CompilerParams(
            dimension_semantics=("parallel", "arbitrary"),
            vmem_limit_bytes=vmem_limit,
        ),
        cost_estimate=pl.CostEstimate(
            flops=3 * n_elems,
            transcendentals=0,
            bytes_accessed=n_elems * itemsize
            + num_splits * _SUBLANES * _LANES * 4,
        ),
    )(x_in)

    # Tiny final reduce (num_splits x 8 x 128) + the folded /2 and the mean.
    total = jnp.sum(partials)
    mean = total / (2.0 * n_elems)
    return mean.astype(orig_dtype)


if __name__ == "__main__":
    key = jax.random.PRNGKey(0)
    # Discriminator outputs for fake samples, e.g. patch-GAN logits: NCHW.
    fake_outputs = jax.random.normal(key, (2, 4, 16, 16), dtype=jnp.float32)

    loss = adversarial_loss(fake_outputs)
    jax.block_until_ready(loss)

    # Reference check in plain JAX.
    ref = jnp.mean((fake_outputs - 1.0) ** 2 / 2.0)
    assert jnp.allclose(loss, ref, rtol=1e-5, atol=1e-6), (loss, ref)

    print("KERNEL_OK")
</pallas_src>

<mosaic_0001>
module attributes {stable_mosaic.version = 11 : i64} {
  func.func @kernel(%arg0: i32, %arg1: i32, %arg2: memref<32x128xf32, #tpu.memory_space<vmem>>, %arg3: memref<1x8x128xf32, #tpu.memory_space<vmem>>) attributes {dimension_semantics = [#tpu.dimension_semantics<parallel>, #tpu.dimension_semantics<arbitrary>], iteration_bounds = array<i64: 1, 1>, scalar_prefetch = 0 : i64, scratch_operands = 0 : i64, tpu.core_type = #tpu.core_type<tc>, window_params = [{transform_indices = @transform_0, window_bounds = array<i64: 32, 128>}, {transform_indices = @transform_1, window_bounds = array<i64: 1, 8, 128>}]} {
    %c0_i32 = arith.constant 0 : i32
    %0 = arith.cmpi eq, %arg1, %c0_i32 : i32
    %1 = arith.extui %0 : i1 to i32
    %c0_i32_0 = arith.constant 0 : i32
    %2 = arith.cmpi ne, %1, %c0_i32_0 : i32
    scf.if %2 {
      %cst = arith.constant 0.000000e+00 : f32
      %11 = vector.broadcast %cst : f32 to vector<1x8x128xf32>
      %c0 = arith.constant 0 : index
      %c0_5 = arith.constant 0 : index
      %c0_6 = arith.constant 0 : index
      %12 = vector.load %arg3[%c0, %c0_5, %c0_6] : memref<1x8x128xf32, #tpu.memory_space<vmem>>, vector<1x8x128xf32>
      tpu.vector_store %arg3[%c0, %c0_5, %c0_6], %11 {strides = array<i32>} : memref<1x8x128xf32, #tpu.memory_space<vmem>>, vector<1x8x128xf32>,
    } else {
    }
    %c1_i32 = arith.constant 1 : i32
    %3 = arith.muli %arg0, %c1_i32 : i32
    %4 = arith.addi %3, %arg1 : i32
    %c0_i32_1 = arith.constant 0 : i32
    %5 = arith.cmpi slt, %4, %c0_i32_1 : i32
    %6 = arith.extui %5 : i1 to i32
    %c0_i32_2 = arith.constant 0 : i32
    %7 = arith.cmpi ne, %6, %c0_i32_2 : i32
    scf.if %7 {
      %c0 = arith.constant 0 : index
      %c0_5 = arith.constant 0 : index
      %11 = vector.load %arg2[%c0, %c0_5] : memref<32x128xf32, #tpu.memory_space<vmem>>, vector<32x128xf32>
      %cst = arith.constant 1.000000e+00 : f32
      %12 = vector.broadcast %cst : f32 to vector<32x128xf32>
      %13 = arith.subf %11, %12 : vector<32x128xf32>
      %14 = arith.mulf %13, %13 : vector<32x128xf32>
      %15 = vector.shape_cast %14 : vector<32x128xf32> to vector<4x8x128xf32>
      %cst_6 = arith.constant dense<0.000000e+00> : vector<8x128xf32>
      %16 = vector.multi_reduction <add>, %15, %cst_6 [0] : vector<4x8x128xf32> to vector<8x128xf32>
      %c0_7 = arith.constant 0 : index
      %c0_8 = arith.constant 0 : index
      %c0_9 = arith.constant 0 : index
      %17 = vector.load %arg3[%c0_7, %c0_8, %c0_9] : memref<1x8x128xf32, #tpu.memory_space<vmem>>, vector<1x8x128xf32>
      %18 = vector.shape_cast %16 : vector<8x128xf32> to vector<1x8x128xf32>
      %19 = arith.addf %17, %18 : vector<1x8x128xf32>
      %c0_10 = arith.constant 0 : index
      %c0_11 = arith.constant 0 : index
      %c0_12 = arith.constant 0 : index
      %20 = vector.load %arg3[%c0_10, %c0_11, %c0_12] : memref<1x8x128xf32, #tpu.memory_space<vmem>>, vector<1x8x128xf32>
      tpu.vector_store %arg3[%c0_10, %c0_11, %c0_12], %19 {strides = array<i32>} : memref<1x8x128xf32, #tpu.memory_space<vmem>>, vector<1x8x128xf32>,
    } else {
    }
    %c0_i32_3 = arith.constant 0 : i32
    %8 = arith.cmpi eq, %4, %c0_i32_3 : i32
    %9 = arith.extui %8 : i1 to i32
    %c0_i32_4 = arith.constant 0 : i32
    %10 = arith.cmpi ne, %9, %c0_i32_4 : i32
    scf.if %10 {
      %c0 = arith.constant 0 : index
      %c0_5 = arith.constant 0 : index
      %11 = vector.load %arg2[%c0, %c0_5] : memref<32x128xf32, #tpu.memory_space<vmem>>, vector<32x128xf32>
      %cst = arith.constant 1.000000e+00 : f32
      %12 = vector.broadcast %cst : f32 to vector<32x128xf32>
      %13 = arith.subf %11, %12 : vector<32x128xf32>
      %14 = arith.mulf %13, %13 : vector<32x128xf32>
      %15 = tpu.iota {dimensions = array<i32: 0>} : vector<32x128xi32>
      %16 = tpu.iota {dimensions = array<i32: 1>} : vector<32x128xi32>
      %c4096_i32 = arith.constant 4096 : i32
      %17 = arith.muli %4, %c4096_i32 : i32
      %c128_i32 = arith.constant 128 : i32
      %18 = vector.broadcast %c128_i32 : i32 to vector<32x128xi32>
      %19 = arith.muli %15, %18 : vector<32x128xi32>
      %20 = vector.broadcast %17 : i32 to vector<32x128xi32>
      %21 = arith.addi %20, %19 : vector<32x128xi32>
      %22 = arith.addi %21, %16 : vector<32x128xi32>
      %c2048_i32 = arith.constant 2048 : i32
      %23 = vector.broadcast %c2048_i32 : i32 to vector<32x128xi32>
      %24 = arith.cmpi slt, %22, %23 : vector<32x128xi32>
      %cst_6 = arith.constant 0.000000e+00 : f32
      %25 = vector.broadcast %cst_6 : f32 to vector<32x128xf32>
      %26 = arith.select %24, %14, %25 : vector<32x128xi1>, vector<32x128xf32>
      %27 = vector.shape_cast %26 : vector<32x128xf32> to vector<4x8x128xf32>
      %cst_7 = arith.constant dense<0.000000e+00> : vector<8x128xf32>
      %28 = vector.multi_reduction <add>, %27, %cst_7 [0] : vector<4x8x128xf32> to vector<8x128xf32>
      %c0_8 = arith.constant 0 : index
      %c0_9 = arith.constant 0 : index
      %c0_10 = arith.constant 0 : index
      %29 = vector.load %arg3[%c0_8, %c0_9, %c0_10] : memref<1x8x128xf32, #tpu.memory_space<vmem>>, vector<1x8x128xf32>
      %30 = vector.shape_cast %28 : vector<8x128xf32> to vector<1x8x128xf32>
      %31 = arith.addf %29, %30 : vector<1x8x128xf32>
      %c0_11 = arith.constant 0 : index
      %c0_12 = arith.constant 0 : index
      %c0_13 = arith.constant 0 : index
      %32 = vector.load %arg3[%c0_11, %c0_12, %c0_13] : memref<1x8x128xf32, #tpu.memory_space<vmem>>, vector<1x8x128xf32>
      tpu.vector_store %arg3[%c0_11, %c0_12, %c0_13], %31 {strides = array<i32>} : memref<1x8x128xf32, #tpu.memory_space<vmem>>, vector<1x8x128xf32>,
    } else {
    }
    return
  }
  func.func @transform_0(%arg0: i32, %arg1: i32) -> (i32, i32) {
    %c1_i32 = arith.constant 1 : i32
    %0 = arith.muli %arg0, %c1_i32 : i32
    %1 = arith.addi %0, %arg1 : i32
    %c0_i32 = arith.constant 0 : i32
    %2 = arith.minsi %1, %c0_i32 : i32
    %c0_i32_0 = arith.constant 0 : i32
    %c0_i32_1 = arith.constant 0 : i32
    return %2, %c0_i32_0 : i32, i32
  }
  func.func @transform_1(%arg0: i32, %arg1: i32) -> (i32, i32, i32) {
    %c0_i32 = arith.constant 0 : i32
    %c0_i32_0 = arith.constant 0 : i32
    %c0_i32_1 = arith.constant 0 : i32
    return %arg0, %c0_i32, %c0_i32_0 : i32, i32, i32
  }
}

</mosaic_0001>

<bundles_post_ra>
// kernel: tpu_custom_call.1
= control target key start
LH: loop header
LB: loop body
LE: loop exit
PB: predicated region body
PF: predicated region fallthrough
CT: control target
= control target key end

     0   :  { %6 = vsyncpa [#allocation3], 0  ;;  %s234_s0 = inlined_call_operand.hbm [shape: f32[16,128], index: 0, kind: input, shape index: {}]   ;;  %s235_s1 = inlined_call_operand.hbm [shape: f32[1,8,128], index: 1, kind: output, shape index: {}]  }
   0x1   :  { %7 = vsyncpa [#allocation4], 0 }
   0x2   :  { %18 = vsyncadd [#allocation3], 256  ;;  %s196_s6 = smov [#allocation2]   ;;  %s148_s10 = scalar_lea.hbm %s234_s0, 256 }
   0x3   :  { %s23_s7 = sshll.u32 %s196_s6, 4  ;;  %p149_p0 = scmp.ne.s32.totalorder %s234_s0, %s148_s10  ;;  %s24_s7 = int_to_ptr.vmem [resolvable:$true] %s23_s7 }
   0x4   :  { %p152_p1 = scmp.lt.u32.totalorder %s148_s10, %s234_s0 }
   0x6   :  { %p154_p2 = pnand %p152_p1, %p149_p0 }
   0x8   :  { %157 = shalt.err (!%p154_p2)
}
   0x9   :  { %s158_s15 = scalar_lea.vmem %s24_s7, 256  ;;  %s162_s16 = scalar_lea.vmem %s24_s7, 512 }
   0xa   :  { %p159_p3 = scmp.ne.s32.totalorder %s24_s7, %s158_s15  ;;  %p163_p4 = scmp.lt.s32.totalorder %s24_s7, %s24_s7 }
   0xb   :  { %p164_p5 = scmp.lt.s32.totalorder %s162_s16, %s158_s15 }
   0xd   :  { %p165_p6 = por %p164_p5, %p163_p4 }
   0xf   :  { %p166_p7 = pnand %p165_p6, %p159_p3 }
  0x11   :  { %169 = shalt.err (!%p166_p7)
}
  0x12   :  { %s197_s17 = smov 128   ;;  %s198_s18 = smov 8  }
  0x13   :  { %29 = dma.hbm_to_vmem [thread:$0]  %s234_s0, 256, %s24_s7, [#allocation3], %s197_s17, %s197_s17, %s198_s18  }
  0x14   :  { %192 = dma.done.wait [#allocation3], 512  }
  0x15   :  { %193 = vsyncadd [#allocation3], 4294966784  ;;  %v83_v0 = vlaneseq  ;;  %v71_v10 = vld [vmem:[#allocation2] sm:$0xff]  ;;  %v72_v11 = vld [vmem:[#allocation2 + $0x8] sm:$0xff]  ;;  %s199_s0 = smov [#allocation5]  }
  0x16   :  { %v73_v12 = vld [vmem:[#allocation2 + $0x10] sm:$0xff]  ;;  %v74_v14 = vld [vmem:[#allocation2 + $0x18] sm:$0xff]  ;;  %v139_v15 = vadd.f32 -1.0, %v71_v10  ;;  %v140_v16 = vadd.f32 -1.0, %v72_v11  ;;  %s124_s21 = sshll.u32 %s199_s0, 4  ;;  %s125_s21 = int_to_ptr.vmem [resolvable:$true] %s124_s21 }
  0x17   :  { %v84_v1 = vshrl.u32 %v83_v0, 7  ;;  %v89_v2 = vand.u32 127, %v83_v0  ;;  %v141_v17 = vadd.f32 -1.0, %v73_v12  ;;  %v142_v19 = vadd.f32 -1.0, %v74_v14  ;;  %s170_s22 = scalar_lea.vmem %s125_s21, 128  ;;  %p175_p9 = scmp.lt.s32.totalorder %s125_s21, %s125_s21 }
  0x18   :  { %v79_v22 = vmul.f32 %v139_v15, %v139_v15  ;;  %v80_v23 = vmul.f32 %v140_v16, %v140_v16  ;;  %p171_p8 = scmp.ne.s32.totalorder %s125_s21, %s170_s22  ;;  %p176_p10 = scmp.lt.s32.totalorder %s170_s22, %s170_s22 }
  0x19   :  { %v85_v3 = vadd.s32 8, %v84_v1  ;;  %v86_v4 = vadd.s32 16, %v84_v1  ;;  %v87_v5 = vadd.s32 24, %v84_v1  ;;  %v91_v6 = vmul.u32 128, %v84_v1 }
  0x1a   :  { %v81_v24 = vmul.f32 %v141_v17, %v141_v17  ;;  %v82_v25 = vmul.f32 %v142_v19, %v142_v19  ;;  %p177_p11 = por %p176_p10, %p175_p9 }
  0x1b   :  { %v92_v7 = vmul.u32 128, %v85_v3  ;;  %v93_v8 = vmul.u32 128, %v86_v4  ;;  %v100_v9 = vadd.s32 %v91_v6, %v89_v2 }
  0x1c   :  { %v94_v13 = vmul.u32 128, %v87_v5  ;;  %p178_p12 = pnand %p177_p11, %p171_p8 }
  0x1d   :  { %v101_v18 = vadd.s32 %v92_v7, %v89_v2  ;;  %v102_v20 = vadd.s32 %v93_v8, %v89_v2  ;;  %vm104_vm0 = vcmp.lt.s32.totalorder %v100_v9, 2048 }
  0x1e   :  { %v103_v21 = vadd.s32 %v94_v13, %v89_v2  ;;  %v108_v26 = vsel %vm104_vm0, %v79_v22, 0.0 }
  0x1f   :  { %vm105_vm1 = vcmp.lt.s32.totalorder %v101_v18, 2048  ;;  %vm106_vm2 = vcmp.lt.s32.totalorder %v102_v20, 2048 }
  0x20   :  { %vm107_vm3 = vcmp.lt.s32.totalorder %v103_v21, 2048  ;;  %v109_v27 = vsel %vm105_vm1, %v80_v23, 0.0  ;;  %v110_v28 = vsel %vm106_vm2, %v81_v24, 0.0 }
  0x21   :  { %v112_v29 = vadd.f32 %v109_v27, %v108_v26  ;;  %v111_v30 = vsel %vm107_vm3, %v82_v25, 0.0 }
  0x23   :  { %v113_v31 = vadd.f32 %v112_v29, %v110_v28 }
  0x25   :  { %v114_v32 = vadd.f32 %v113_v31, %v111_v30 }
  0x27   :  { %117 = vst [vmem:[#allocation5] sm:$0xff] %v114_v32 }
  0x28   :  { %181 = shalt.err (!%p178_p12)
}
  0x29   :  { %s182_s25 = scalar_lea.hbm %s235_s1, 128 }
  0x2a   :  { %p183_p13 = scmp.ne.s32.totalorder %s235_s1, %s182_s25  ;;  %p186_p0 = scmp.lt.u32.totalorder %s182_s25, %s235_s1 }
  0x2c   :  { %p188_p1 = pnand %p186_p0, %p183_p13 }
  0x2e   :  { %191 = shalt.err (!%p188_p1)
}
  0x2f   :  { %127 = dma.vmem_to_hbm [thread:$0]  %s125_s21, 128, %s235_s1, [#allocation4]  }
  0x30   :  { %194 = dma.done.wait [#allocation4], 128  }
  0x31   :  { %195 = vsyncadd [#allocation4], 4294967168 }
  0x32   :  { %131 = vsyncpa [#allocation3], 1 }
  0x33   :  { %132 = vsyncpa [#allocation4], 1 }

</bundles_post_ra>
